<compile_context>
chip_gen: v5e
topology: v5e:2x2
jax: 0.10.0
libtpu: 0.0.40
codegen_flags: <defaults>
</compile_context>

<pallas_src>
import math

import jax
import jax.numpy as jnp
from jax import lax
from jax.experimental import pallas as pl
from jax.experimental.pallas import tpu as pltpu


def _round_up(n, m):
    return -(-n // m) * m


# --------------------------------- kernel ---------------------------------
def location_layer_kernel(x_ref, w_ref, o_ref):
    """x_ref: (bb*2, Tpad_al)  row = 2*b + c, lanes = zero-padded time (lane-dense).
    w_ref: (2K, A)          fused conv+dense weight, row = 2*k + c.
    o_ref: (bb, T, A)       processed attention for this batch block."""
    bb, T, A = o_ref.shape
    K = w_ref.shape[0] // 2

    x = x_ref[...]                                               # (bb*2, Tpad_al)

    # im2col with full-lane-width rows stacked along sublanes:
    #   cols[2*k + c, b*T + t] = x[2*b + c, t + k]
    # Each (b, k) piece keeps time in lanes, so it is a (2, T) lane-shifted
    # copy (~T/128 vector stores) rather than a masked 2-lane insert.
    per_batch = []
    for b in range(bb):
        xb = x[2 * b:2 * b + 2, :]                               # (2, Tpad_al)
        per_batch.append(
            jnp.concatenate([xb[:, k:k + T] for k in range(K)], axis=0))  # (2K, T)
    cols = per_batch[0] if bb == 1 else jnp.concatenate(per_batch, axis=1)  # (2K, bb*T)

    # One long-M MXU matmul for the whole block: contract the fused
    # (tap, channel) sublane axis of cols against w_loc; accumulate in f32.
    out = lax.dot_general(cols, w_ref[...], (((0,), (0,)), ((), ())),
                          preferred_element_type=jnp.float32)    # (bb*T, A)
    o_ref[...] = out.reshape(bb, T, A).astype(o_ref.dtype)


# ----------------------------- block selection -----------------------------
def _block_vmem_bytes(bb, T, A, K, Tpad_al, compute_itemsize, out_itemsize):
    """Honest (tile-padded) VMEM working-set estimate for one grid step."""
    r8 = lambda n: _round_up(n, 8)
    r128 = lambda n: _round_up(n, 128)
    x_blk = r8(bb * 2) * r128(Tpad_al) * compute_itemsize          # lane-dense input block
    w_blk = r8(2 * K) * r128(A) * compute_itemsize
    cols = r8(2 * K) * r128(bb * T) * compute_itemsize             # im2col value
    cols_t = r8(bb * T) * r128(2 * K) * compute_itemsize           # possible relayout for transposed-LHS matmul
    acc = r8(bb * T) * r128(A) * 4                                 # f32 matmul result
    out_blk = bb * r8(T) * r128(A) * out_itemsize
    return 2 * (x_blk + out_blk) + 2 * w_blk + cols + cols_t + acc  # 2x = double buffering


def _choose_block_b(B_pad, T, A, K, Tpad_al, compute_itemsize, out_itemsize,
                    budget_bytes=26 * 1024 * 1024):
    # bb must be a multiple of 4 so the input block's first dim (bb*2) is a
    # sublane multiple of 8 (B_pad is padded to a multiple of 4 by the caller).
    candidates = [bb for bb in range(4, B_pad + 1, 4) if B_pad % bb == 0]
    if not candidates:
        candidates = [B_pad]
    fitting = [bb for bb in candidates
               if _block_vmem_bytes(bb, T, A, K, Tpad_al, compute_itemsize,
                                    out_itemsize) <= budget_bytes]
    if not fitting:
        fitting = [candidates[0]]
    # Prefer >= 2 grid steps so the "parallel" batch axis can shard across the
    # two TensorCores of a v7x chip; otherwise take the largest fitting block.
    multi = [bb for bb in fitting if B_pad // bb >= 2]
    return max(multi) if multi else max(fitting)


# --------------------------------- wrapper ---------------------------------
def location_layer_forward(attention_weights_cat, params, *, block_b=None,
                           compute_dtype=jnp.float32, out_dtype=jnp.float32):
    wconv, wdense = params['wconv'], params['wdense']
    B, C, T = attention_weights_cat.shape
    assert C == 2, "LocationLayer expects 2 stacked attention-weight channels"
    F_, C2, K = wconv.shape
    assert C2 == 2 and wdense.shape[0] == F_
    assert K % 2 == 1, "padding=(K-1)//2 only reproduces torch 'same' conv for odd K"
    A = wdense.shape[1]
    pad = (K - 1) // 2

    # 1) Fuse conv + dense weights once (tiny):
    #    w_loc[2*k + c, a] = sum_f Wconv[f, c, k] * Wdense[f, a]
    w_loc = jnp.einsum('fck,fa->kca', wconv.astype(jnp.float32),
                       wdense.astype(jnp.float32))
    w_loc = w_loc.reshape(2 * K, A).astype(compute_dtype)

    # 2) Time-in-lanes conv input: rows = (b, c), lanes = zero-padded time
    #    rounded up to a multiple of 128 (lane-dense DMA, aligned lane slices).
    Tpad_al = _round_up(T + 2 * pad, 128)
    compute_itemsize = jnp.dtype(compute_dtype).itemsize
    out_itemsize = jnp.dtype(out_dtype).itemsize

    if block_b is None:
        B_pad = _round_up(B, 4)
        block_b = _choose_block_b(B_pad, T, A, K, Tpad_al, compute_itemsize,
                                  out_itemsize)
    else:
        B_pad = _round_up(B, block_b)
        if block_b % 4 != 0 and block_b != B_pad:
            raise ValueError("block_b must be a multiple of 4 (sublane-aligned "
                             "input block) or cover the whole padded batch")
    grid = (B_pad // block_b,)

    x = jnp.pad(attention_weights_cat.astype(compute_dtype),
                ((0, B_pad - B), (0, 0), (pad, Tpad_al - T - pad)))
    x = x.reshape(B_pad * 2, Tpad_al)      # row = 2*b + c, lanes = padded time

    vmem_est = _block_vmem_bytes(block_b, T, A, K, Tpad_al, compute_itemsize,
                                 out_itemsize)
    vmem_limit = int(min(48 * 1024 * 1024,
                         max(32 * 1024 * 1024, int(1.5 * vmem_est))))

    out = pl.pallas_call(
        location_layer_kernel,
        grid=grid,
        in_specs=[
            pl.BlockSpec((block_b * 2, Tpad_al), lambda i: (i, 0)),
            pl.BlockSpec((2 * K, A), lambda i: (0, 0)),
        ],
        out_specs=pl.BlockSpec((block_b, T, A), lambda i: (i, 0, 0)),
        out_shape=jax.ShapeDtypeStruct((B_pad, T, A), out_dtype),
        compiler_params=pltpu.CompilerParams(
            dimension_semantics=("parallel",),
            vmem_limit_bytes=vmem_limit),
    )(x, w_loc)
    return out if B_pad == B else out[:B]


# ---------------- deterministic parameter init (xavier_uniform, torch fans) ----------------
def _xavier_uniform(key, shape, fan_in, fan_out, gain):
    bound = gain * math.sqrt(6.0 / (fan_in + fan_out))
    return jax.random.uniform(key, shape, jnp.float32, -bound, bound)


def init_location_layer_params(key, attention_n_filters, attention_kernel_size,
                               attention_dim):
    k1, k2 = jax.random.split(key, 2)
    # location_conv: Conv1d(2 -> F, K), gain='linear'; torch fans: in*K / out*K
    wconv = _xavier_uniform(k1, (attention_n_filters, 2, attention_kernel_size),
                            fan_in=2 * attention_kernel_size,
                            fan_out=attention_n_filters * attention_kernel_size,
                            gain=1.0)
    # location_dense: Linear(F -> A), gain='tanh'; stored transposed (F, A)
    tanh_gain = 5.0 / 3.0
    wdense = _xavier_uniform(k2, (attention_n_filters, attention_dim),
                             fan_in=attention_n_filters, fan_out=attention_dim,
                             gain=tanh_gain)
    return {'wconv': wconv, 'wdense': wdense}


# --------------------- pure-JAX reference (correctness check) ---------------------
def reference_forward(attention_weights_cat, params):
    wconv, wdense = params['wconv'], params['wdense']
    K = wconv.shape[2]
    pad = (K - 1) // 2
    conv = lax.conv_general_dilated(attention_weights_cat, wconv, (1,), [(pad, pad)],
                                    dimension_numbers=('NCH', 'OIH', 'NCH'))  # (B, F, T)
    return jnp.einsum('bft,fa->bta', conv, wdense)                            # (B, T, A)


if __name__ == "__main__":
    B, T = 8, 24
    attention_n_filters = 8
    attention_kernel_size = 5
    attention_dim = 16

    key = jax.random.PRNGKey(0)
    kp, ka = jax.random.split(key, 2)

    params = init_location_layer_params(kp, attention_n_filters,
                                        attention_kernel_size, attention_dim)
    attention_weights_cat = jax.random.uniform(ka, (B, 2, T), jnp.float32)

    ref = reference_forward(attention_weights_cat, params)

    # Default f32 path: auto-chosen block_b=4 -> grid=(2,) exercises the
    # batch-tiled parallel grid; strict check vs the XLA reference.
    out = location_layer_forward(attention_weights_cat, params)
    jax.block_until_ready(out)
    assert out.shape == (B, T, attention_dim)
    assert jnp.allclose(out, ref, atol=1e-4, rtol=1e-4), \
        float(jnp.max(jnp.abs(out - ref)))

    # Optional bf16 MXU path (halves input DMA / cols VMEM; f32 accumulation,
    # f32 output). Tolerance reflects bf16 input/weight rounding only.
    out_bf16 = location_layer_forward(attention_weights_cat, params,
                                      compute_dtype=jnp.bfloat16)
    jax.block_until_ready(out_bf16)
    assert jnp.allclose(out_bf16, ref, atol=1e-1, rtol=1e-2), \
        float(jnp.max(jnp.abs(out_bf16 - ref)))

    print("KERNEL_OK")
</pallas_src>

<mosaic_0001>
module attributes {stable_mosaic.version = 11 : i64} {
  func.func @location_layer_kernel(%arg0: i32, %arg1: memref<8x128xf32, #tpu.memory_space<vmem>>, %arg2: memref<10x16xf32, #tpu.memory_space<vmem>>, %arg3: memref<4x24x16xf32, #tpu.memory_space<vmem>>) attributes {dimension_semantics = [#tpu.dimension_semantics<parallel>], iteration_bounds = array<i64: 2>, scalar_prefetch = 0 : i64, scratch_operands = 0 : i64, tpu.core_type = #tpu.core_type<tc>, window_params = [{transform_indices = @transform_0, window_bounds = array<i64: 8, 128>}, {pipeline_mode = #tpu.pipeline_mode<synchronous>, transform_indices = @transform_1, window_bounds = array<i64: 10, 16>}, {transform_indices = @transform_2, window_bounds = array<i64: 4, 24, 16>}]} {
    %c0 = arith.constant 0 : index
    %c0_0 = arith.constant 0 : index
    %0 = vector.load %arg1[%c0, %c0_0] : memref<8x128xf32, #tpu.memory_space<vmem>>, vector<8x128xf32>
    %1 = vector.extract_strided_slice %0 {offsets = [0, 0], sizes = [2, 128], strides = [1, 1]} : vector<8x128xf32> to vector<2x128xf32>
    %2 = vector.extract_strided_slice %1 {offsets = [0, 0], sizes = [2, 24], strides = [1, 1]} : vector<2x128xf32> to vector<2x24xf32>
    %3 = vector.extract_strided_slice %1 {offsets = [0, 1], sizes = [2, 24], strides = [1, 1]} : vector<2x128xf32> to vector<2x24xf32>
    %4 = vector.extract_strided_slice %1 {offsets = [0, 2], sizes = [2, 24], strides = [1, 1]} : vector<2x128xf32> to vector<2x24xf32>
    %5 = vector.extract_strided_slice %1 {offsets = [0, 3], sizes = [2, 24], strides = [1, 1]} : vector<2x128xf32> to vector<2x24xf32>
    %6 = vector.extract_strided_slice %1 {offsets = [0, 4], sizes = [2, 24], strides = [1, 1]} : vector<2x128xf32> to vector<2x24xf32>
    %7 = tpu.concatenate %2, %3, %4, %5, %6 in 0 : vector<2x24xf32>, vector<2x24xf32>, vector<2x24xf32>, vector<2x24xf32>, vector<2x24xf32> -> vector<10x24xf32>
    %8 = vector.extract_strided_slice %0 {offsets = [2, 0], sizes = [2, 128], strides = [1, 1]} : vector<8x128xf32> to vector<2x128xf32>
    %9 = vector.extract_strided_slice %8 {offsets = [0, 0], sizes = [2, 24], strides = [1, 1]} : vector<2x128xf32> to vector<2x24xf32>
    %10 = vector.extract_strided_slice %8 {offsets = [0, 1], sizes = [2, 24], strides = [1, 1]} : vector<2x128xf32> to vector<2x24xf32>
    %11 = vector.extract_strided_slice %8 {offsets = [0, 2], sizes = [2, 24], strides = [1, 1]} : vector<2x128xf32> to vector<2x24xf32>
    %12 = vector.extract_strided_slice %8 {offsets = [0, 3], sizes = [2, 24], strides = [1, 1]} : vector<2x128xf32> to vector<2x24xf32>
    %13 = vector.extract_strided_slice %8 {offsets = [0, 4], sizes = [2, 24], strides = [1, 1]} : vector<2x128xf32> to vector<2x24xf32>
    %14 = tpu.concatenate %9, %10, %11, %12, %13 in 0 : vector<2x24xf32>, vector<2x24xf32>, vector<2x24xf32>, vector<2x24xf32>, vector<2x24xf32> -> vector<10x24xf32>
    %15 = vector.extract_strided_slice %0 {offsets = [4, 0], sizes = [2, 128], strides = [1, 1]} : vector<8x128xf32> to vector<2x128xf32>
    %16 = vector.extract_strided_slice %15 {offsets = [0, 0], sizes = [2, 24], strides = [1, 1]} : vector<2x128xf32> to vector<2x24xf32>
    %17 = vector.extract_strided_slice %15 {offsets = [0, 1], sizes = [2, 24], strides = [1, 1]} : vector<2x128xf32> to vector<2x24xf32>
    %18 = vector.extract_strided_slice %15 {offsets = [0, 2], sizes = [2, 24], strides = [1, 1]} : vector<2x128xf32> to vector<2x24xf32>
    %19 = vector.extract_strided_slice %15 {offsets = [0, 3], sizes = [2, 24], strides = [1, 1]} : vector<2x128xf32> to vector<2x24xf32>
    %20 = vector.extract_strided_slice %15 {offsets = [0, 4], sizes = [2, 24], strides = [1, 1]} : vector<2x128xf32> to vector<2x24xf32>
    %21 = tpu.concatenate %16, %17, %18, %19, %20 in 0 : vector<2x24xf32>, vector<2x24xf32>, vector<2x24xf32>, vector<2x24xf32>, vector<2x24xf32> -> vector<10x24xf32>
    %22 = vector.extract_strided_slice %0 {offsets = [6, 0], sizes = [2, 128], strides = [1, 1]} : vector<8x128xf32> to vector<2x128xf32>
    %23 = vector.extract_strided_slice %22 {offsets = [0, 0], sizes = [2, 24], strides = [1, 1]} : vector<2x128xf32> to vector<2x24xf32>
    %24 = vector.extract_strided_slice %22 {offsets = [0, 1], sizes = [2, 24], strides = [1, 1]} : vector<2x128xf32> to vector<2x24xf32>
    %25 = vector.extract_strided_slice %22 {offsets = [0, 2], sizes = [2, 24], strides = [1, 1]} : vector<2x128xf32> to vector<2x24xf32>
    %26 = vector.extract_strided_slice %22 {offsets = [0, 3], sizes = [2, 24], strides = [1, 1]} : vector<2x128xf32> to vector<2x24xf32>
    %27 = vector.extract_strided_slice %22 {offsets = [0, 4], sizes = [2, 24], strides = [1, 1]} : vector<2x128xf32> to vector<2x24xf32>
    %28 = tpu.concatenate %23, %24, %25, %26, %27 in 0 : vector<2x24xf32>, vector<2x24xf32>, vector<2x24xf32>, vector<2x24xf32>, vector<2x24xf32> -> vector<10x24xf32>
    %29 = tpu.concatenate %7, %14, %21, %28 in 1 : vector<10x24xf32>, vector<10x24xf32>, vector<10x24xf32>, vector<10x24xf32> -> vector<10x96xf32>
    %c0_1 = arith.constant 0 : index
    %c0_2 = arith.constant 0 : index
    %30 = vector.load %arg2[%c0_1, %c0_2] : memref<10x16xf32, #tpu.memory_space<vmem>>, vector<10x16xf32>
    %cst = arith.constant dense<0.000000e+00> : vector<96x16xf32>
    %31 = tpu.matmul %29, %30, %cst {dimension_numbers = #tpu.dot_dimension_numbers<[0], [0], [1], [1], [0, 1, 1, 1], [], []>} : vector<10x96xf32>, vector<10x16xf32>, vector<96x16xf32> -> vector<96x16xf32>
    %32 = vector.shape_cast %31 : vector<96x16xf32> to vector<4x24x16xf32>
    %c0_3 = arith.constant 0 : index
    %c0_4 = arith.constant 0 : index
    %c0_5 = arith.constant 0 : index
    %33 = vector.load %arg3[%c0_3, %c0_4, %c0_5] : memref<4x24x16xf32, #tpu.memory_space<vmem>>, vector<4x24x16xf32>
    tpu.vector_store %arg3[%c0_3, %c0_4, %c0_5], %32 {strides = array<i32>} : memref<4x24x16xf32, #tpu.memory_space<vmem>>, vector<4x24x16xf32>,
    return
  }
  func.func @transform_0(%arg0: i32) -> (i32, i32) {
    %c0_i32 = arith.constant 0 : i32
    %c0_i32_0 = arith.constant 0 : i32
    return %arg0, %c0_i32 : i32, i32
  }
  func.func @transform_1(%arg0: i32) -> (i32, i32) {
    %c0_i32 = arith.constant 0 : i32
    %c0_i32_0 = arith.constant 0 : i32
    %c0_i32_1 = arith.constant 0 : i32
    return %c0_i32, %c0_i32_0 : i32, i32
  }
  func.func @transform_2(%arg0: i32) -> (i32, i32, i32) {
    %c0_i32 = arith.constant 0 : i32
    %c0_i32_0 = arith.constant 0 : i32
    %c0_i32_1 = arith.constant 0 : i32
    return %arg0, %c0_i32, %c0_i32_0 : i32, i32, i32
  }
}

</mosaic_0001>

<bundles_post_ra>
// kernel: tpu_custom_call.1
= control target key start
LH: loop header
LB: loop body
LE: loop exit
PB: predicated region body
PF: predicated region fallthrough
CT: control target
= control target key end

     0   :  { %7 = vsyncpa [#allocation3], 0  ;;  %s875_s0 = inlined_call_operand.hbm [shape: f32[16,128], index: 0, kind: input, shape index: {}]   ;;  %s876_s1 = inlined_call_operand.hbm [shape: f32[10,16], index: 1, kind: input, shape index: {}]   ;;  %s877_s2 = inlined_call_operand.vmem [shape: f32[8,24,16], index: 2, kind: output, shape index: {}]  }
   0x1   :  { %9 = vsyncpa [#allocation3 + $0x1], 0 }
   0x2   :  { %10 = vsyncpa [#allocation5], 0  ;;  %s719_s9 = smov 0   ;;  %s721_s10 = smov 0  }
   0x3   :  { %s723_s11 = smov 0   ;;  %s725_s12 = smov 0  }
   0x4 LB: > { %s105_s15 = sshll.u32 %s876_s1, 4  ;;  %s500_s16 = sadd.s32 4294967295, %s692_s12   ;;  %s692_s12 = sphi %s725_s12, %s885_s12   ;;  %s688_s11 = sphi %s723_s11, %s884_s11   ;;  %s684_s10 = sphi %s721_s10, %s883_s10   ;;  %s680_s9 = sphi %s719_s9, %s882_s9   ;;  %s106_s15 = int_to_ptr.hbm [resolvable:$true] %s105_s15 }
   0x5   : > { %p502_p0 = scmp.ge.s32.totalorder %s692_s12, 1  ;;  %p744_p1 = scmp.eq.s32.totalorder %s500_s16, 0 }
   0x6   : > { %p94_p2 = scmp.lt.s32.totalorder %s692_s12, 3  ;;  %s694_s19 = smov [#allocation4]  }
   0x7   : > { %s107_s20 = sshll.u32 %s694_s19, 4  ;;  %s695_s21 = smov 128   ;;  %s108_s20 = int_to_ptr.vmem [resolvable:$true] %s107_s20 }
   0x8   : > { %p749_p3 = pnand %p502_p0, %p94_p2  ;;  %s696_s22 = smov 8  }
   0x9   : > { %s758_s23 = sadd.s32 1, %s692_s12   ;;  %s23_s25 = sadd.s32 1, %s688_s11 }
   0xa   : > { %p540_p4 = pneg %p749_p3  ;;  %s20_s24 = ssub.s32 %s692_s12, %s758_s23 }
   0xb   : > { %p21_p6 = scmp.eq.s32.totalorder %s20_s24, 0  ;;  %p30_p7 = scmp.ne.s32.totalorder %s688_s11, %s684_s10 }
   0xc   : > { %p541_p5 = pnand %p540_p4, %p744_p1  ;;  %p31_p8 = scmp.eq.s32.totalorder %s692_s12, 0 }
   0xd   : > { %p36_p9 = scmp.ne.s32.totalorder %s684_s10, %s680_s9  ;;  %p549_p12 = scmp.lt.s32.totalorder %s692_s12, 2 }
   0xe   : > { %543 = dma.hbm_to_vmem [thread:$0]  (!%p541_p5), %s106_s15, 256, %s108_s20, [#allocation5], %s695_s21, %s695_s21, %s696_s22  }
   0xf   : > { %s768_s26 = scalar_select %p21_p6, %s688_s11, %s23_s25  }
  0x10   : > { %p32_p10 = por %p31_p8, %p30_p7  ;;  %p772_p11 = por %p744_p1, %p36_p9 }
  0x11   : > { %s121_s28 = sand.u32 1, %s688_s11   ;;  %s506_s30 = sshll.u32 %s692_s12, 3 }
  0x12   : > { %s505_s29 = sshll.u32 %s121_s28, 3  ;;  %s129_s5 = scalar_lea.hbm %s875_s0, %s506_s30 }
  0x13   : > { %s125_s6 = scalar_lea.vmem [#allocation2], %s505_s29  ;;  %s131_s8 = sshll.u32 %s129_s5, 4  ;;  %s132_s8 = int_to_ptr.hbm [resolvable:$true] %s131_s8 }
  0x14   : > { %s133_s7 = sshll.u32 %s125_s6, 4  ;;  %p782_p13 = pnand %p549_p12, %p32_p10  ;;  %s134_s7 = int_to_ptr.vmem [resolvable:$true] %s133_s7 }
  0x15   : > { %s122_s13 = scalar_lea.sflag [#allocation3], %s121_s28  ;;  %s624_s14 = sshra.s32 %s132_s8, 4  ;;  %s625_s14 = int_to_ptr.hbm [resolvable:$true] %s624_s14 }
  0x16   : > { %s626_s15 = scalar_lea.hbm %s625_s14, 8  ;;  %p628_p2 = pneg %p782_p13 }
  0x17   : > { %p627_p0 = scmp.ne.s32.totalorder %s625_s14, %s626_s15  ;;  %s631_s21 = scalar_lea.hbm %s875_s0, 16 }
  0x18   : > { %p632_p6 = scmp.lt.s32.totalorder %s625_s14, %s875_s0  ;;  %p633_p7 = scmp.lt.s32.totalorder %s631_s21, %s626_s15 }
  0x19   : > { %p629_p4 = pnand %p628_p2, %p627_p0 }
  0x1a   : > { %p634_p8 = por %p633_p7, %p632_p6 }
  0x1b   : > { %p630_p5 = pneg %p629_p4 }
  0x1d   : > { %p635_p9 = pnand %p634_p8, %p630_p5 }
  0x1f   : > { %638 = shalt.err (!%p635_p9)
}
  0x20   : > { %547 = dma.hbm_to_vmem [thread:$0]  (!%p782_p13), %s132_s8, 128, %s134_s7, %s122_s13  }
  0x21   : > { %142 = sbr.rel (%p749_p3) target bundleno = 692 (0x2b4), region = 28  ;;  %s144_s25 = sand.u32 (!%p749_p3), 1, %s684_s10  }
  0x22   : > { %s508_s28 = sshll.u32 (!%p749_p3), %s144_s25, 3  ;;  %s145_s29 = scalar_lea.sflag (!%p749_p3), [#allocation3], %s144_s25 }
  0x23   : > { %s148_s30 = scalar_lea.vmem (!%p749_p3), [#allocation2], %s508_s28 }
  0x26   : > { %671 = dma.done.wait (%p772_p11), %s145_s29, 128  }
  0x27   : > { %673 = vsyncadd (%p772_p11), %s145_s29, 4294967168 }
  0x28   : > { %675 = dma.done.wait (%p744_p1), [#allocation5], 256  }
  0x29   : > { %677 = vsyncadd (%p744_p1), [#allocation5], 4294967040  ;;  %v807_v0 = vld [vmem:[%s148_s30] sm:$0xff]  ;;  %s697_s18 = smov 127   ;;  %s698_s3 = smov 126   ;;  %vm200_vm0 = vcmask 1041408  }
  0x2a   : > { %207 = vrot.lane.b32.xlu0 %v807_v0, %s697_s18  ;;  %v193_v1 = vrot.slane %v807_v0, 2  ;;  %225 = vrot.lane.b32.xlu2 %v807_v0, %s698_s3  ;;  %v185_v2 = vrot.slane %v807_v0, 6  ;;  %v189_v3 = vrot.slane %v807_v0, 4  ;;  %s699_s27 = smov 125   ;;  %s700_s17 = smov 124   ;;  %vm202_vm1 = vcmask 1043456  }
  0x2b   : > { %vm204_vm2 = vcmask 1045504   ;;  %s701_s4 = smov 24   ;;  %s702_s5 = smov 72   ;;  %v282_v26 = vld [vmem:[#allocation4 + $0x8] sm:$0x3]  ;;  %v281_v27 = vld [vmem:[#allocation4] sm:$0xff] }
  0x2c   : > { %222 = vrot.lane.b32.xlu1 %v193_v1, %s697_s18  ;;  %s703_s6 = smov 48   ;;  %512 = vmatpush.msk.msra.mxu0 %vm200_vm0, %v282_v26  ;;  %vm272_vm3 = vcmask 195584   ;;  %vm275_vm4 = vcmask 392192   ;;  %vm278_vm5 = vcmask 588800   ;;  %vm315_vm6 = vcmask 80896   ;;  %s510_s7 = sshll.u32 %s500_s16, 2 }
  0x2d   : > { %527 = vmatpush.msk.msra.mxu1 %vm200_vm0, %v282_v26  ;;  %528 = vmatpush.msk.msra.mxu2 %vm200_vm0, %v282_v26  ;;  %p177_p1 = scmp.lt.s32.totalorder %s510_s7, 7  ;;  %vm408_vm7 = vcmask 130048  }
  0x2e   : > { %529 = vmatpush.msk.msra.mxu3 %vm200_vm0, %v282_v26  ;;  %370 = vmatpush.msra.mxu0 %v281_v27 }
  0x2f   : > { %530 = vmatpush.msra.mxu1 %v281_v27  ;;  %531 = vmatpush.msra.mxu2 %v281_v27  ;;  %s887_s7 = smov (!%p177_p1, %s510_s7), 7 }
  0x30   : > { %532 = vmatpush.msra.mxu3 %v281_v27  ;;  %s533_s8 = smul.u32 24, %s887_s7 }
  0x32   : > { %210 = vrot.lane.b32.xlu0 %v185_v2, %s698_s3  ;;  %237 = vrot.lane.b32.xlu2 %v189_v3, %s697_s18  ;;  %s181_s14 = scalar_lea.vmem %s877_s2, %s533_s8 }
  0x34   : > { %213 = vrot.lane.b32.xlu1 %v189_v3, %s699_s27 }
  0x3a   : > { %228 = vrot.lane.b32.xlu0 %v185_v2, %s699_s27  ;;  %243 = vrot.lane.b32.xlu2 %v807_v0, %s699_s27 }
  0x3c   : > { %240 = vrot.lane.b32.xlu1 %v193_v1, %s698_s3 }
  0x42   : > { %216 = vrot.lane.b32.xlu0 %v193_v1, %s700_s17  ;;  %246 = vrot.lane.b32.xlu2 %v185_v2, %s700_s17 }
  0x44   : > { %231 = vrot.lane.b32.xlu1 %v189_v3, %s700_s17 }
  0x4a   : > { %186 = vrot.lane.b32.xlu0 %v185_v2, %s697_s18  ;;  %194 = vrot.lane.b32.xlu2 %v193_v1, %s699_s27 }
  0x4c   : > { %190 = vrot.lane.b32.xlu1 %v189_v3, %s698_s3 }
  0x52   : > { %197 = vrot.lane.b32.xlu0 %v807_v0, %s700_s17 }
  0x84   : > { %v226_v4 = vpop.permute.xlu2 %225 }
  0x8c   : > { %v238_v5 = vpop.permute.xlu2 %237 }
  0x8d   : > { %v248_v14 = vsel %vm200_vm0, %v185_v2, %v238_v5 }
  0x94   : > { %v244_v8 = vpop.permute.xlu2 %243 }
  0x9c   : > { %v208_v6 = vpop.permute.xlu0 %207  ;;  %v247_v16 = vpop.permute.xlu2 %246 }
  0x9d   : > { %v218_v9 = vsel %vm200_vm0, %v193_v1, %v208_v6 }
  0x9e   : > { %v223_v7 = vpop.permute.xlu1 %222 }
  0x9f   : > { %v233_v21 = vsel %vm200_vm0, %v189_v3, %v223_v7 }
  0xa0   : > { %v234_v23 = vsel %vm202_vm1, %v233_v21, %v226_v4 }
  0xa4   : > { %v211_v10 = vpop.permute.xlu0 %210  ;;  %v195_v29 = vpop.permute.xlu2 %194 }
  0xa5   : > { %v219_v11 = vsel %vm202_vm1, %v218_v9, %v211_v10 }
  0xa6   : > { %v214_v12 = vpop.permute.xlu1 %213 }
  0xa7   : > { %v220_v13 = vsel %vm204_vm2, %v219_v11, %v214_v12 }
  0xa8   : > { %252 = vrot.lane.b32.xlu0 %v220_v13, %s701_s4 }
  0xac   : > { %v229_v15 = vpop.permute.xlu0 %228 }
  0xad   : > { %v235_v24 = vsel %vm204_vm2, %v234_v23, %v229_v15 }
  0xae   : > { %v241_v17 = vpop.permute.xlu1 %240 }
  0xaf   : > { %v249_v18 = vsel %vm202_vm1, %v248_v14, %v241_v17 }
  0xb0   : > { %268 = vrot.lane.b32.xlu0 %v247_v16, %s702_s5  ;;  %v250_v19 = vsel %vm204_vm2, %v249_v18, %v244_v8 }
  0xb1   : > { %266 = vrot.lane.b32.xlu2 %v250_v19, %s702_s5 }
  0xb4   : > { %v217_v20 = vpop.permute.xlu0 %216 }
  0xb5   : > { %254 = vrot.lane.b32.xlu1 %v217_v20, %s701_s4 }
  0xb6   : > { %v232_v22 = vpop.permute.xlu1 %231 }
  0xb9   : > { %261 = vrot.lane.b32.xlu2 %v232_v22, %s703_s6 }
  0xbc   : > { %v187_v25 = vpop.permute.xlu0 %186 }
  0xbd   : > { %259 = vrot.lane.b32.xlu1 %v235_v24, %s703_s6  ;;  %v201_v31 = vsel %vm200_vm0, %v807_v0, %v187_v25 }
  0xbe   : > { %v191_v28 = vpop.permute.xlu1 %190 }
  0xbf   : > { %v203_v33 = vsel %vm202_vm1, %v201_v31, %v191_v28 }
  0xc0   : > { %v205_v35 = vsel %vm204_vm2, %v203_v33, %v195_v29 }
  0xc4   : > { %v198_v30 = vpop.permute.xlu0 %197 }
 0x10b   : > { %v267_v34 = vpop.permute.xlu2 %266 }
 0x113   : > { %v262_v42 = vpop.permute.xlu2 %261 }
 0x11a   : > { %v253_v36 = vpop.permute.xlu0 %252 }
 0x11b   : > { %v273_v37 = vsel %vm272_vm3, %v205_v35, %v253_v36 }
 0x122   : > { %v269_v44 = vpop.permute.xlu0 %268 }
 0x127   : > { %v255_v32 = vpop.permute.xlu1 %254 }
 0x128   : > { %v274_v41 = vsel %vm272_vm3, %v198_v30, %v255_v32 }
 0x129   : > { %v277_v43 = vsel %vm275_vm4, %v274_v41, %v262_v42 }
 0x12a   : > { %v280_v45 = vsel %vm278_vm5, %v277_v43, %v269_v44 }
 0x12f   : > { %v260_v38 = vpop.permute.xlu1 %259 }
 0x130   : > { %v276_v39 = vsel %vm275_vm4, %v273_v37, %v260_v38 }
 0x131   : > { %v279_v40 = vsel %vm278_vm5, %v276_v39, %v267_v34 }
 0x132   : > { %283 = vxpose.xlu1.b32.start [1/2] (short) (narrow) %v279_v40, 96 }
 0x13a   : > { %284 = vxpose.xlu1.b32.end [2/2] (short) (narrow) %v280_v45, 96 }
 0x1d6   : > { %v299_v46 = vpop.trf.xlu1 }
 0x1d7   : > { %513 = vmatmul.msk.f32.vlgmr.msra.gmra.mxu0 %vm315_vm6, %v299_v46 }
 0x1de   : > { %v300_v47 = vpop.trf.xlu1 }
 0x1df   : > { %514 = vmatmul.msk.f32.gmra.mxu0 %vm315_vm6, %v300_v47 }
 0x1e6   : > { %v301_v48 = vpop.trf.xlu1 }
 0x1e7   : > { %515 = vmatmul.msk.f32.gmra.mxu0 %vm315_vm6, %v301_v48 }
 0x1ee   : > { %v302_v49 = vpop.trf.xlu1 }
 0x1ef   : > { %516 = vmatmul.msk.f32.vlgmr.msra.gmra.mxu1 %vm315_vm6, %v302_v49 }
 0x1f6   : > { %v303_v50 = vpop.trf.xlu1 }
 0x1f7   : > { %517 = vmatmul.msk.f32.gmra.mxu1 %vm315_vm6, %v303_v50 }
 0x1fe   : > { %v304_v51 = vpop.trf.xlu1 }
 0x1ff   : > { %518 = vmatmul.msk.f32.gmra.mxu1 %vm315_vm6, %v304_v51 }
 0x206   : > { %v305_v52 = vpop.trf.xlu1 }
 0x207   : > { %519 = vmatmul.msk.f32.vlgmr.msra.gmra.mxu2 %vm315_vm6, %v305_v52 }
 0x20e   : > { %v306_v53 = vpop.trf.xlu1 }
 0x20f   : > { %520 = vmatmul.msk.f32.gmra.mxu2 %vm315_vm6, %v306_v53 }
 0x216   : > { %v307_v54 = vpop.trf.xlu1 }
 0x217   : > { %521 = vmatmul.msk.f32.gmra.mxu2 %vm315_vm6, %v307_v54 }
 0x21e   : > { %v308_v55 = vpop.trf.xlu1 }
 0x21f   : > { %522 = vmatmul.msk.f32.vlgmr.msra.gmra.mxu3 %vm315_vm6, %v308_v55 }
 0x226   : > { %v309_v56 = vpop.trf.xlu1 }
 0x227   : > { %523 = vmatmul.msk.f32.gmra.mxu3 %vm315_vm6, %v309_v56 }
 0x22e   : > { %v310_v57 = vpop.trf.xlu1 }
 0x22f   : > { %524 = vmatmul.msk.f32.gmra.mxu3 %vm315_vm6, %v310_v57 }
 0x254   : > { %v372_v58 = vpop.f32.mrf.mxu0 }
 0x255   : > { %409 = vst.msk [vmem:[%s181_s14] sm:$0xff] %vm408_vm7, %v372_v58 }
 0x25c   : > { %v375_v59 = vpop.f32.mrf.mxu0 }
 0x25d   : > { %410 = vst.msk [vmem:[%s181_s14 + $0x8] sm:$0xff] %vm408_vm7, %v375_v59 }
 0x264   : > { %v378_v60 = vpop.f32.mrf.mxu0 }
 0x265   : > { %411 = vst.msk [vmem:[%s181_s14 + $0x10] sm:$0xff] %vm408_vm7, %v378_v60 }
 0x26c   : > { %v381_v61 = vpop.f32.mrf.mxu1 }
 0x26d   : > { %412 = vst.msk [vmem:[%s181_s14 + $0x18] sm:$0xff] %vm408_vm7, %v381_v61 }
 0x274   : > { %v384_v62 = vpop.f32.mrf.mxu1 }
 0x275   : > { %413 = vst.msk [vmem:[%s181_s14 + $0x20] sm:$0xff] %vm408_vm7, %v384_v62 }
 0x27c   : > { %v387_v63 = vpop.f32.mrf.mxu1 }
 0x27d   : > { %414 = vst.msk [vmem:[%s181_s14 + $0x28] sm:$0xff] %vm408_vm7, %v387_v63 }
 0x28a   : > { %v390_v0 = vpop.f32.mrf.mxu2 }
 0x28b   : > { %415 = vst.msk [vmem:[%s181_s14 + $0x30] sm:$0xff] %vm408_vm7, %v390_v0 }
 0x292   : > { %v393_v1 = vpop.f32.mrf.mxu2 }
 0x293   : > { %416 = vst.msk [vmem:[%s181_s14 + $0x38] sm:$0xff] %vm408_vm7, %v393_v1 }
 0x29a   : > { %v396_v2 = vpop.f32.mrf.mxu2 }
 0x29b   : > { %417 = vst.msk [vmem:[%s181_s14 + $0x40] sm:$0xff] %vm408_vm7, %v396_v2 }
 0x2a2   : > { %v399_v3 = vpop.f32.mrf.mxu3 }
 0x2a3   : > { %418 = vst.msk [vmem:[%s181_s14 + $0x48] sm:$0xff] %vm408_vm7, %v399_v3 }
 0x2aa   : > { %v402_v4 = vpop.f32.mrf.mxu3 }
 0x2ab   : > { %419 = vst.msk [vmem:[%s181_s14 + $0x50] sm:$0xff] %vm408_vm7, %v402_v4 }
 0x2b2   : > { %v405_v5 = vpop.f32.mrf.mxu3 }
 0x2b3   : > { %420 = vst.msk [vmem:[%s181_s14 + $0x58] sm:$0xff] %vm408_vm7, %v405_v5 }
 0x2b4 PF: > { %p13_p3 = scmp.ge.s32.totalorder %s758_s23, 4   ;;  %s882_s9 = smov %s684_s10 }
 0x2b5   : > { %s883_s10 = smov %s688_s11  ;;  %s884_s11 = smov %s768_s26 }
 0x2b6   : > { %s885_s12 = smov %s758_s23  ;;  %15 = sbr.rel (!%p13_p3) target bundleno = 4 (0x4), region = 72 }
 0x2bb   :  { %445 = vsyncpa [#allocation3], 1 }
 0x2bc   :  { %447 = vsyncpa [#allocation3 + $0x1], 1 }
 0x2bd   :  { %448 = vsyncpa [#allocation5], 1 }

</bundles_post_ra>
